<compile_context>
chip_gen: v5e
topology: v5e:2x2
jax: 0.10.0
libtpu: 0.0.40
codegen_flags: <defaults>
</compile_context>

<pallas_src>
import functools

import jax
import jax.numpy as jnp
from jax.experimental import pallas as pl
from jax.experimental.pallas import tpu as pltpu


def _wave_end_kernel(n_layers, x_ref, *refs):
    """refs = (w0, b0, w1, b1, ..., out_ref).

    x_ref: (C_in, tl) activation tile (batch dim squeezed by BlockSpec).
    w_i:   (C_out_i, C_in_i) bf16, b_i: (C_out_i, 1) f32.
    """
    out_ref = refs[-1]
    param_refs = refs[:-1]

    h = x_ref[...]                                           # (C_in, tl)
    for layer in range(n_layers):
        w = param_refs[2 * layer][...]                       # (C_out, C_in) bf16
        b = param_refs[2 * layer + 1][...]                   # (C_out, 1)  f32
        h = jnp.maximum(h, 0).astype(jnp.bfloat16)           # ReLU (VPU) + bf16 operand
        # 1x1 conv == channel matmul on the MXU, f32 accumulation.
        h = jnp.dot(w, h, preferred_element_type=jnp.float32) + b
    out_ref[...] = h.astype(out_ref.dtype)


def _vmem_budget_bytes():
    """Per-generation scoped-VMEM budget (leaves headroom for Mosaic scratch)."""
    try:
        phys = pltpu.get_tpu_info().vmem_capacity_bytes
    except Exception:  # no info available -> assume the smallest (v7x) VMEM
        phys = 64 << 20
    if phys >= (128 << 20):
        return 96 << 20      # v5e / v6e: 128 MiB physical
    return 44 << 20          # v7x: 64 MiB physical


def _pick_tile_l(L, N, per_lane_bytes, vmem_budget_bytes, param_bytes,
                 max_tl=2048, min_grid_steps=4):
    """Pick a lane tile that fits the VMEM budget, stays <= max_tl lanes
    (bigger tiles add no bandwidth, only VMEM pressure), and leaves enough
    grid steps for v7x megacore sharding and DMA/compute pipelining."""
    avail = max(vmem_budget_bytes - param_bytes, 128 * per_lane_bytes)
    cap = avail // max(per_lane_bytes, 1)
    cap = max(128, min(cap, max_tl))
    cap = (cap // 128) * 128                      # lane-dense multiple of 128

    if L <= 128:
        return L                                  # full-L block (small-L path)

    want_l_blocks = max(1, -(-min_grid_steps // max(N, 1)))
    if want_l_blocks > 1:
        split = -(-L // want_l_blocks)            # ceil(L / wanted blocks)
        split = max(128, ((split + 127) // 128) * 128)
        cap = min(cap, split)

    if cap >= L:
        return L                                  # full-L block is always legal
    return cap


def _wave_end_call(x_in, w_list, b_list, tl, vmem_limit, single_buffer_params):
    N, C_in, L = x_in.shape
    C_out = w_list[-1].shape[0]
    n_layers = len(w_list)
    grid = (N, pl.cdiv(L, tl))

    in_specs = [pl.BlockSpec((None, C_in, tl), lambda n, j: (n, 0, j))]
    param_kwargs = {}
    if single_buffer_params:
        # Constant index_map -> fetched once; single-buffer to save VMEM.
        param_kwargs = dict(pipeline_mode=pl.Buffered(1))
    for w, b in zip(w_list, b_list):
        in_specs.append(pl.BlockSpec(w.shape, lambda n, j: (0, 0), **param_kwargs))
        in_specs.append(pl.BlockSpec(b.shape, lambda n, j: (0, 0), **param_kwargs))
    out_spec = pl.BlockSpec((None, C_out, tl), lambda n, j: (n, 0, j))

    act_bytes = N * L * (C_in + C_out) * x_in.dtype.itemsize
    param_bytes = (sum(w.size * w.dtype.itemsize for w in w_list)
                   + sum(b.size * b.dtype.itemsize for b in b_list))
    cost = pl.CostEstimate(
        flops=2 * N * L * sum(w.shape[0] * w.shape[1] for w in w_list),
        transcendentals=0,
        bytes_accessed=act_bytes + param_bytes)

    return pl.pallas_call(
        functools.partial(_wave_end_kernel, n_layers),
        out_shape=jax.ShapeDtypeStruct((N, C_out, L), x_in.dtype),
        grid=grid,
        in_specs=in_specs,
        out_specs=out_spec,
        compiler_params=pltpu.CompilerParams(
            dimension_semantics=("parallel", "parallel"),
            vmem_limit_bytes=vmem_limit),
        cost_estimate=cost,
    )(x_in, *[p for wb in zip(w_list, b_list) for p in wb])


def wave_end_forward(inputs, weights, biases):
    """inputs = (x, skip); x is ignored (matches WaveEnd.forward).

    skip: (N, C_in, L).  weights[i]: (C_{i+1}, C_i) (PyTorch Conv1d weight
    squeezed).  biases[i]: (C_{i+1},).  Returns (N, C_out, L) in skip.dtype.
    """
    _, skip = inputs
    N, C_in, L = skip.shape
    C_out = weights[-1].shape[0]
    channels = [C_in] + [w.shape[0] for w in weights]

    # bf16 matmul operands (MXU-native everywhere), f32 biases/accumulation.
    w_bf16 = [w.astype(jnp.bfloat16) for w in weights]
    b_col = [b.astype(jnp.float32).reshape(-1, 1) for b in biases]

    # Small-L path: fold the batch into the lane axis so output stores are as
    # lane-dense as possible (L < 128 would otherwise hit masked vst.msk).
    folded = (L < 128) and (N > 1)
    if folded:
        x_in = jnp.transpose(skip, (1, 0, 2)).reshape(1, C_in, N * L)
    else:
        x_in = skip
    n_eff, _, l_eff = x_in.shape

    vmem_budget = _vmem_budget_bytes()
    itemsize = skip.dtype.itemsize
    # Per-lane VMEM: double-buffered in/out activation tiles + ~3 live f32
    # intermediates in the chained layer computation.
    per_lane = 2 * C_in * itemsize + 2 * C_out * itemsize + 3 * max(channels) * 4
    # Parameter VMEM, conservatively assuming double buffering (covers the
    # fallback path when Buffered(1) is unavailable).
    param_bytes = 2 * (sum(w.size * 2 for w in w_bf16) + sum(b.size * 4 for b in b_col))
    tl = _pick_tile_l(l_eff, n_eff, per_lane, vmem_budget, param_bytes)

    try:
        out = _wave_end_call(x_in, w_bf16, b_col, tl, vmem_budget,
                             single_buffer_params=True)
    except Exception:
        # Fallback if this JAX/Mosaic build rejects pipeline_mode=Buffered(1).
        out = _wave_end_call(x_in, w_bf16, b_col, tl, vmem_budget,
                             single_buffer_params=False)

    if folded:
        out = jnp.transpose(out.reshape(C_out, N, L), (1, 0, 2))
    return out


def wave_end_reference(skip, weights, biases):
    """Pure-JAX f32 reference matching the PyTorch Sequential exactly."""
    h = skip  # (N, C, L)
    for w, b in zip(weights, biases):
        h = jnp.maximum(h, 0.0)
        h = jnp.einsum("oc,ncl->nol", w, h) + b[None, :, None]
    return h


if __name__ == "__main__":
    # WaveEnd(4, 32, 16): ReLU, Conv1d(4->32, k=1), ReLU, Conv1d(32->16, k=1)
    channels = (4, 32, 16)
    N, L = 2, 16

    key = jax.random.PRNGKey(0)
    k_x, k_skip, *k_params = jax.random.split(key, 2 + (len(channels) - 1))

    x = jax.random.normal(k_x, (N, channels[0], L), dtype=jnp.float32)   # ignored
    skip = jax.random.normal(k_skip, (N, channels[0], L), dtype=jnp.float32)

    weights, biases = [], []
    for idx, (ci, co) in enumerate(zip(channels[:-1], channels[1:])):
        kw, kb = jax.random.split(k_params[idx])
        scale = 1.0 / jnp.sqrt(jnp.float32(ci))
        # Stored in PyTorch Conv1d orientation: (C_out, C_in) == weight[..., 0]
        weights.append(jax.random.uniform(kw, (co, ci), jnp.float32, -scale, scale))
        biases.append(jax.random.uniform(kb, (co,), jnp.float32, -scale, scale))

    out = wave_end_forward((x, skip), weights, biases)
    out = jax.block_until_ready(out)

    ref = wave_end_reference(skip, weights, biases)
    assert out.shape == (N, channels[-1], L), out.shape
    # bf16 matmul operands (f32 accumulation) -> loosened tolerance vs f32 ref.
    assert jnp.allclose(out, ref, atol=5e-2, rtol=5e-2), "mismatch vs reference"

    print("KERNEL_OK")
</pallas_src>

<mosaic_0001>
module attributes {stable_mosaic.version = 11 : i64} {
  func.func @_wave_end_kernel(%arg0: i32, %arg1: i32, %arg2: memref<1x4x32xf32, #tpu.memory_space<vmem>>, %arg3: memref<32x4xbf16, #tpu.memory_space<vmem>>, %arg4: memref<32x1xf32, #tpu.memory_space<vmem>>, %arg5: memref<16x32xbf16, #tpu.memory_space<vmem>>, %arg6: memref<16x1xf32, #tpu.memory_space<vmem>>, %arg7: memref<1x16x32xf32, #tpu.memory_space<vmem>>) attributes {dimension_semantics = [#tpu.dimension_semantics<parallel>, #tpu.dimension_semantics<parallel>], iteration_bounds = array<i64: 1, 1>, scalar_prefetch = 0 : i64, scratch_operands = 0 : i64, tpu.core_type = #tpu.core_type<tc>, window_params = [{transform_indices = @transform_0, window_bounds = array<i64: 1, 4, 32>}, {pipeline_mode = #tpu.pipeline_mode<synchronous>, transform_indices = @transform_1, window_bounds = array<i64: 32, 4>}, {pipeline_mode = #tpu.pipeline_mode<synchronous>, transform_indices = @transform_2, window_bounds = array<i64: 32, 1>}, {pipeline_mode = #tpu.pipeline_mode<synchronous>, transform_indices = @transform_3, window_bounds = array<i64: 16, 32>}, {pipeline_mode = #tpu.pipeline_mode<synchronous>, transform_indices = @transform_4, window_bounds = array<i64: 16, 1>}, {transform_indices = @transform_5, window_bounds = array<i64: 1, 16, 32>}]} {
    %c0 = arith.constant 0 : index
    %c0_0 = arith.constant 0 : index
    %c0_1 = arith.constant 0 : index
    %0 = vector.load %arg2[%c0, %c0_0, %c0_1] : memref<1x4x32xf32, #tpu.memory_space<vmem>>, vector<1x4x32xf32>
    %1 = vector.shape_cast %0 : vector<1x4x32xf32> to vector<4x32xf32>
    %c0_2 = arith.constant 0 : index
    %c0_3 = arith.constant 0 : index
    %2 = vector.load %arg3[%c0_2, %c0_3] : memref<32x4xbf16, #tpu.memory_space<vmem>>, vector<32x4xbf16>
    %c0_4 = arith.constant 0 : index
    %c0_5 = arith.constant 0 : index
    %3 = vector.load %arg4[%c0_4, %c0_5] : memref<32x1xf32, #tpu.memory_space<vmem>>, vector<32x1xf32>
    %cst = arith.constant 0.000000e+00 : f32
    %4 = vector.broadcast %cst : f32 to vector<4x32xf32>
    %5 = arith.maximumf %1, %4 : vector<4x32xf32>
    %6 = arith.truncf %5 : vector<4x32xf32> to vector<4x32xbf16>
    %cst_6 = arith.constant dense<0.000000e+00> : vector<32x32xf32>
    %7 = tpu.matmul %2, %6, %cst_6 {dimension_numbers = #tpu.dot_dimension_numbers<[1], [0], [0], [1], [0, 0, 1, 1], [], []>} : vector<32x4xbf16>, vector<4x32xbf16>, vector<32x32xf32> -> vector<32x32xf32>
    %8 = vector.broadcast %3 : vector<32x1xf32> to vector<32x32xf32>
    %9 = arith.addf %7, %8 : vector<32x32xf32>
    %c0_7 = arith.constant 0 : index
    %c0_8 = arith.constant 0 : index
    %10 = vector.load %arg5[%c0_7, %c0_8] : memref<16x32xbf16, #tpu.memory_space<vmem>>, vector<16x32xbf16>
    %c0_9 = arith.constant 0 : index
    %c0_10 = arith.constant 0 : index
    %11 = vector.load %arg6[%c0_9, %c0_10] : memref<16x1xf32, #tpu.memory_space<vmem>>, vector<16x1xf32>
    %cst_11 = arith.constant 0.000000e+00 : f32
    %12 = vector.broadcast %cst_11 : f32 to vector<32x32xf32>
    %13 = arith.maximumf %9, %12 : vector<32x32xf32>
    %14 = arith.truncf %13 : vector<32x32xf32> to vector<32x32xbf16>
    %cst_12 = arith.constant dense<0.000000e+00> : vector<16x32xf32>
    %15 = tpu.matmul %10, %14, %cst_12 {dimension_numbers = #tpu.dot_dimension_numbers<[1], [0], [0], [1], [0, 0, 1, 1], [], []>} : vector<16x32xbf16>, vector<32x32xbf16>, vector<16x32xf32> -> vector<16x32xf32>
    %16 = vector.broadcast %11 : vector<16x1xf32> to vector<16x32xf32>
    %17 = arith.addf %15, %16 : vector<16x32xf32>
    %c0_13 = arith.constant 0 : index
    %c0_14 = arith.constant 0 : index
    %c0_15 = arith.constant 0 : index
    %18 = vector.load %arg7[%c0_13, %c0_14, %c0_15] : memref<1x16x32xf32, #tpu.memory_space<vmem>>, vector<1x16x32xf32>
    %19 = vector.shape_cast %18 : vector<1x16x32xf32> to vector<16x32xf32>
    %20 = vector.shape_cast %17 : vector<16x32xf32> to vector<1x16x32xf32>
    tpu.vector_store %arg7[%c0_13, %c0_14, %c0_15], %20 {strides = array<i32>} : memref<1x16x32xf32, #tpu.memory_space<vmem>>, vector<1x16x32xf32>,
    return
  }
  func.func @transform_0(%arg0: i32, %arg1: i32) -> (i32, i32, i32) {
    %c0_i32 = arith.constant 0 : i32
    %c0_i32_0 = arith.constant 0 : i32
    return %arg0, %c0_i32, %arg1 : i32, i32, i32
  }
  func.func @transform_1(%arg0: i32, %arg1: i32) -> (i32, i32) {
    %c0_i32 = arith.constant 0 : i32
    %c0_i32_0 = arith.constant 0 : i32
    %c0_i32_1 = arith.constant 0 : i32
    return %c0_i32, %c0_i32_0 : i32, i32
  }
  func.func @transform_2(%arg0: i32, %arg1: i32) -> (i32, i32) {
    %c0_i32 = arith.constant 0 : i32
    %c0_i32_0 = arith.constant 0 : i32
    %c0_i32_1 = arith.constant 0 : i32
    return %c0_i32, %c0_i32_0 : i32, i32
  }
  func.func @transform_3(%arg0: i32, %arg1: i32) -> (i32, i32) {
    %c0_i32 = arith.constant 0 : i32
    %c0_i32_0 = arith.constant 0 : i32
    %c0_i32_1 = arith.constant 0 : i32
    return %c0_i32, %c0_i32_0 : i32, i32
  }
  func.func @transform_4(%arg0: i32, %arg1: i32) -> (i32, i32) {
    %c0_i32 = arith.constant 0 : i32
    %c0_i32_0 = arith.constant 0 : i32
    %c0_i32_1 = arith.constant 0 : i32
    return %c0_i32, %c0_i32_0 : i32, i32
  }
  func.func @transform_5(%arg0: i32, %arg1: i32) -> (i32, i32, i32) {
    %c0_i32 = arith.constant 0 : i32
    %c0_i32_0 = arith.constant 0 : i32
    return %arg0, %c0_i32, %arg1 : i32, i32, i32
  }
}

module attributes {stable_mosaic.version = 11 : i64} {
  func.func @_wave_end_kernel(%arg0: i32, %arg1: i32, %arg2: memref<1x4x32xf32, #tpu.memory_space<vmem>>, %arg3: memref<32x4xbf16, #tpu.memory_space<vmem>>, %arg4: memref<32x1xf32, #tpu.memory_space<vmem>>, %arg5: memref<16x32xbf16, #tpu.memory_space<vmem>>, %arg6: memref<16x1xf32, #tpu.memory_space<vmem>>, %arg7: memref<1x16x32xf32, #tpu.memory_space<vmem>>) attributes {dimension_semantics = [#tpu.dimension_semantics<parallel>, #tpu.dimension_semantics<parallel>], iteration_bounds = array<i64: 1, 1>, scalar_prefetch = 0 : i64, scratch_operands = 0 : i64, tpu.core_type = #tpu.core_type<tc>, window_params = [{transform_indices = @transform_0, window_bounds = array<i64: 1, 4, 32>}, {pipeline_mode = #tpu.pipeline_mode<synchronous>, transform_indices = @transform_1, window_bounds = array<i64: 32, 4>}, {pipeline_mode = #tpu.pipeline_mode<synchronous>, transform_indices = @transform_2, window_bounds = array<i64: 32, 1>}, {pipeline_mode = #tpu.pipeline_mode<synchronous>, transform_indices = @transform_3, window_bounds = array<i64: 16, 32>}, {pipeline_mode = #tpu.pipeline_mode<synchronous>, transform_indices = @transform_4, window_bounds = array<i64: 16, 1>}, {transform_indices = @transform_5, window_bounds = array<i64: 1, 16, 32>}]} {
    %c0 = arith.constant 0 : index
    %c0_0 = arith.constant 0 : index
    %c0_1 = arith.constant 0 : index
    %0 = vector.load %arg2[%c0, %c0_0, %c0_1] : memref<1x4x32xf32, #tpu.memory_space<vmem>>, vector<1x4x32xf32>
    %1 = vector.shape_cast %0 : vector<1x4x32xf32> to vector<4x32xf32>
    %c0_2 = arith.constant 0 : index
    %c0_3 = arith.constant 0 : index
    %2 = vector.load %arg3[%c0_2, %c0_3] : memref<32x4xbf16, #tpu.memory_space<vmem>>, vector<32x4xbf16>
    %c0_4 = arith.constant 0 : index
    %c0_5 = arith.constant 0 : index
    %3 = vector.load %arg4[%c0_4, %c0_5] : memref<32x1xf32, #tpu.memory_space<vmem>>, vector<32x1xf32>
    %cst = arith.constant 0.000000e+00 : f32
    %4 = vector.broadcast %cst : f32 to vector<4x32xf32>
    %5 = arith.maximumf %1, %4 : vector<4x32xf32>
    %6 = arith.truncf %5 : vector<4x32xf32> to vector<4x32xbf16>
    %cst_6 = arith.constant dense<0.000000e+00> : vector<32x32xf32>
    %7 = tpu.matmul %2, %6, %cst_6 {dimension_numbers = #tpu.dot_dimension_numbers<[1], [0], [0], [1], [0, 0, 1, 1], [], []>} : vector<32x4xbf16>, vector<4x32xbf16>, vector<32x32xf32> -> vector<32x32xf32>
    %8 = vector.broadcast %3 : vector<32x1xf32> to vector<32x32xf32>
    %9 = arith.addf %7, %8 : vector<32x32xf32>
    %c0_7 = arith.constant 0 : index
    %c0_8 = arith.constant 0 : index
    %10 = vector.load %arg5[%c0_7, %c0_8] : memref<16x32xbf16, #tpu.memory_space<vmem>>, vector<16x32xbf16>
    %c0_9 = arith.constant 0 : index
    %c0_10 = arith.constant 0 : index
    %11 = vector.load %arg6[%c0_9, %c0_10] : memref<16x1xf32, #tpu.memory_space<vmem>>, vector<16x1xf32>
    %cst_11 = arith.constant 0.000000e+00 : f32
    %12 = vector.broadcast %cst_11 : f32 to vector<32x32xf32>
    %13 = arith.maximumf %9, %12 : vector<32x32xf32>
    %14 = arith.truncf %13 : vector<32x32xf32> to vector<32x32xbf16>
    %cst_12 = arith.constant dense<0.000000e+00> : vector<16x32xf32>
    %15 = tpu.matmul %10, %14, %cst_12 {dimension_numbers = #tpu.dot_dimension_numbers<[1], [0], [0], [1], [0, 0, 1, 1], [], []>} : vector<16x32xbf16>, vector<32x32xbf16>, vector<16x32xf32> -> vector<16x32xf32>
    %16 = vector.broadcast %11 : vector<16x1xf32> to vector<16x32xf32>
    %17 = arith.addf %15, %16 : vector<16x32xf32>
    %c0_13 = arith.constant 0 : index
    %c0_14 = arith.constant 0 : index
    %c0_15 = arith.constant 0 : index
    %18 = vector.load %arg7[%c0_13, %c0_14, %c0_15] : memref<1x16x32xf32, #tpu.memory_space<vmem>>, vector<1x16x32xf32>
    %19 = vector.shape_cast %18 : vector<1x16x32xf32> to vector<16x32xf32>
    %20 = vector.shape_cast %17 : vector<16x32xf32> to vector<1x16x32xf32>
    tpu.vector_store %arg7[%c0_13, %c0_14, %c0_15], %20 {strides = array<i32>} : memref<1x16x32xf32, #tpu.memory_space<vmem>>, vector<1x16x32xf32>,
    return
  }
  func.func @transform_0(%arg0: i32, %arg1: i32) -> (i32, i32, i32) {
    %c0_i32 = arith.constant 0 : i32
    %c0_i32_0 = arith.constant 0 : i32
    return %arg0, %c0_i32, %arg1 : i32, i32, i32
  }
  func.func @transform_1(%arg0: i32, %arg1: i32) -> (i32, i32) {
    %c0_i32 = arith.constant 0 : i32
    %c0_i32_0 = arith.constant 0 : i32
    %c0_i32_1 = arith.constant 0 : i32
    return %c0_i32, %c0_i32_0 : i32, i32
  }
  func.func @transform_2(%arg0: i32, %arg1: i32) -> (i32, i32) {
    %c0_i32 = arith.constant 0 : i32
    %c0_i32_0 = arith.constant 0 : i32
    %c0_i32_1 = arith.constant 0 : i32
    return %c0_i32, %c0_i32_0 : i32, i32
  }
  func.func @transform_3(%arg0: i32, %arg1: i32) -> (i32, i32) {
    %c0_i32 = arith.constant 0 : i32
    %c0_i32_0 = arith.constant 0 : i32
    %c0_i32_1 = arith.constant 0 : i32
    return %c0_i32, %c0_i32_0 : i32, i32
  }
  func.func @transform_4(%arg0: i32, %arg1: i32) -> (i32, i32) {
    %c0_i32 = arith.constant 0 : i32
    %c0_i32_0 = arith.constant 0 : i32
    %c0_i32_1 = arith.constant 0 : i32
    return %c0_i32, %c0_i32_0 : i32, i32
  }
  func.func @transform_5(%arg0: i32, %arg1: i32) -> (i32, i32, i32) {
    %c0_i32 = arith.constant 0 : i32
    %c0_i32_0 = arith.constant 0 : i32
    return %arg0, %c0_i32, %arg1 : i32, i32, i32
  }
}

</mosaic_0001>

<bundles_post_ra>
// kernel: tpu_custom_call.1
= control target key start
LH: loop header
LB: loop body
LE: loop exit
PB: predicated region body
PF: predicated region fallthrough
CT: control target
= control target key end

     0   :  { %vm70_vm0 = vcmask 1041408   ;;  %v208_v4 = vmov 0   ;;  %s275_s0 = inlined_call_operand.vmem [shape: f32[1,4,32], index: 0, kind: input, shape index: {}]   ;;  %s276_s1 = inlined_call_operand.vmem [shape: bf16[32,4], index: 1, kind: input, shape index: {}]   ;;  %s277_s2 = inlined_call_operand.vmem [shape: f32[32,1], index: 2, kind: input, shape index: {}]   ;;  %s278_s3 = inlined_call_operand.vmem [shape: bf16[16,32], index: 3, kind: input, shape index: {}]   ;;  %s279_s4 = inlined_call_operand.vmem [shape: f32[16,1], index: 4, kind: input, shape index: {}]   ;;  %s280_s5 = inlined_call_operand.hbm [shape: f32[1,16,32], index: 5, kind: output, shape index: {}]  }
   0x1   :  { %v22_v0 = vld [vmem:[%s275_s0] sm:$0xf]  ;;  %v29_v2 = vld [vmem:[%s277_s2 + $0x10] sm:$0xff]  ;;  %179 = vset.pattern.permute.xlu0 %v208_v4  ;;  %180 = vset.pattern.permute.xlu1 %v208_v4 }
   0x2   :  { %v31_v1 = vmax.f32 %v22_v0, 0.0  ;;  %v27_v3 = vld [vmem:[%s277_s2] sm:$0xff] }
   0x3   :  { %10 = vsyncpa [#allocation3], 0  ;;  %45 = vperm.xlu0 %179, %v29_v2   ;;  %35 = vperm.xlu1 %180, %v27_v3   ;;  %v172_v7 = vld [vmem:[%s276_s1 + $0x8] sm:$0xff]  ;;  %v171_v8 = vld [vmem:[%s276_s1] sm:$0xff]  ;;  %vm63_vm1 = vcmask 31744   ;;  %vm118_vm2 = vcmask 261120  }
   0x4   :  { %v32_v5 = vpack.c.bf16 %v31_v1, %v31_v1  ;;  %181 = vset.pattern.permute.xlu2 %v208_v4  ;;  %v30_v9 = vld [vmem:[%s277_s2 + $0x18] sm:$0xff]  ;;  %v28_v10 = vld [vmem:[%s277_s2 + $0x8] sm:$0xff]  ;;  %v95_v11 = vld [vmem:[%s279_s4] sm:$0xff]  ;;  %s209_s9 = smov [#allocation2]   ;;  %s144_s13 = sshll.u32 %s280_s5, 4  ;;  %s145_s13 = int_to_ptr.hbm [resolvable:$true] %s144_s13 }
   0x5   :  { %105 = vperm.xlu2 %181, %v95_v11   ;;  %v96_v14 = vld [vmem:[%s279_s4 + $0x8] sm:$0xff]  ;;  %v173_v31 = vld [vmem:[%s278_s3] sm:$0xff]  ;;  %s142_s10 = sshll.u32 %s209_s9, 4  ;;  %s210_s3 = smov 128   ;;  %s143_s10 = int_to_ptr.vmem [resolvable:$true] %s142_s10 }
   0x6   :  { %v72_v6 = vsel %vm70_vm0, %v32_v5, 0  ;;  %s211_s14 = smov 8  }
   0x7   :  { %174 = vmatpush.bf16.msra.mxu2 %v72_v6  ;;  %81 = vmatpush.bf16.msra.mxu0 %v72_v6 }
   0xa   :  { %165 = vmatmul.msk.bf16.vlgmr.msra.gmra.mxu2 %vm63_vm1, %v172_v7  ;;  %164 = vmatmul.msk.bf16.vlgmr.msra.gmra.mxu0 %vm63_vm1, %v171_v8 }
   0xb   :  { %50 = vperm.xlu0 %179, %v30_v9   ;;  %40 = vperm.xlu1 %180, %v28_v10  }
   0xd   :  { %110 = vperm.xlu2 %181, %v96_v14  }
  0x5f   :  { %v106_v32 = vpop.permute.xlu2 %105 }
  0x67   :  { %v111_v35 = vpop.permute.xlu2 %110 }
  0x75   :  { %v36_v12 = vpop.permute.xlu1 %35  ;;  %v46_v15 = vpop.permute.xlu0 %45 }
  0x7d   :  { %v41_v17 = vpop.permute.xlu1 %40  ;;  %v51_v20 = vpop.permute.xlu0 %50 }
  0x87   :  { %v83_v13 = vpop.f32.mrf.mxu0 }
  0x88   :  { %v84_v22 = vadd.f32 %v83_v13, %v36_v12 }
  0x8a   :  { %v97_v27 = vmax.f32 %v84_v22, 0.0 }
  0x8d   :  { %v88_v16 = vpop.f32.mrf.mxu2 }
  0x8e   :  { %v89_v19 = vadd.f32 %v88_v16, %v46_v15 }
  0x8f   :  { %v85_v18 = vpop.f32.mrf.mxu0 }
  0x90   :  { %v86_v23 = vadd.f32 %v85_v18, %v41_v17  ;;  %v99_v25 = vmax.f32 %v89_v19, 0.0 }
  0x92   :  { %v98_v28 = vmax.f32 %v86_v23, 0.0 }
  0x94   :  { %v101_v30 = vpack.c.bf16 %v98_v28, %v97_v27 }
  0x95   :  { %v90_v21 = vpop.f32.mrf.mxu2 }
  0x96   :  { %v91_v24 = vadd.f32 %v90_v21, %v51_v20 }
  0x98   :  { %v100_v26 = vmax.f32 %v91_v24, 0.0 }
  0x9a   :  { %v102_v29 = vpack.c.bf16 %v100_v26, %v99_v25 }
  0x9c   :  { %128 = vmatpush.bf16.msra.mxu1 %v102_v29 }
  0xa0   :  { %129 = vmatpush.bf16.msra.mxu1 %v101_v30 }
  0xa3   :  { %170 = vmatmul.msk.bf16.vlgmr.msra.gmra.mxu1 %vm118_vm2, %v173_v31 }
 0x120   :  { %v131_v33 = vpop.f32.mrf.mxu1 }
 0x121   :  { %v132_v34 = vadd.f32 %v131_v33, %v106_v32 }
 0x123   :  { %136 = vst.msk [vmem:[#allocation2] sm:$0xff] %vm118_vm2, %v132_v34 }
 0x128   :  { %v133_v36 = vpop.f32.mrf.mxu1 }
 0x129   :  { %v134_v37 = vadd.f32 %v133_v36, %v111_v35 }
 0x12b   :  { %137 = vst.msk [vmem:[#allocation2 + $0x8] sm:$0xff] %vm118_vm2, %v134_v37 }
 0x12c   :  { %150 = dma.vmem_to_hbm [thread:$0]  %s143_s10, 256, %s145_s13, [#allocation3], %s210_s3, %s210_s3, %s211_s14  }
 0x12d   :  { %206 = dma.done.wait [#allocation3], 256  }
 0x12e   :  { %207 = vsyncadd [#allocation3], 4294967040 }
 0x12f   :  { %155 = vsyncpa [#allocation3], 1 }

// kernel: tpu_custom_call.1
= control target key start
LH: loop header
LB: loop body
LE: loop exit
PB: predicated region body
PF: predicated region fallthrough
CT: control target
= control target key end

     0   :  { %vm70_vm0 = vcmask 1041408   ;;  %v208_v4 = vmov 0   ;;  %s275_s0 = inlined_call_operand.vmem [shape: f32[1,4,32], index: 0, kind: input, shape index: {}]   ;;  %s276_s1 = inlined_call_operand.vmem [shape: bf16[32,4], index: 1, kind: input, shape index: {}]   ;;  %s277_s2 = inlined_call_operand.vmem [shape: f32[32,1], index: 2, kind: input, shape index: {}]   ;;  %s278_s3 = inlined_call_operand.vmem [shape: bf16[16,32], index: 3, kind: input, shape index: {}]   ;;  %s279_s4 = inlined_call_operand.vmem [shape: f32[16,1], index: 4, kind: input, shape index: {}]   ;;  %s280_s5 = inlined_call_operand.hbm [shape: f32[1,16,32], index: 5, kind: output, shape index: {}]  }
   0x1   :  { %v22_v0 = vld [vmem:[%s275_s0] sm:$0xf]  ;;  %v29_v2 = vld [vmem:[%s277_s2 + $0x10] sm:$0xff]  ;;  %179 = vset.pattern.permute.xlu0 %v208_v4  ;;  %180 = vset.pattern.permute.xlu1 %v208_v4 }
   0x2   :  { %v31_v1 = vmax.f32 %v22_v0, 0.0  ;;  %v27_v3 = vld [vmem:[%s277_s2] sm:$0xff] }
   0x3   :  { %10 = vsyncpa [#allocation3], 0  ;;  %45 = vperm.xlu0 %179, %v29_v2   ;;  %35 = vperm.xlu1 %180, %v27_v3   ;;  %v172_v7 = vld [vmem:[%s276_s1 + $0x8] sm:$0xff]  ;;  %v171_v8 = vld [vmem:[%s276_s1] sm:$0xff]  ;;  %vm63_vm1 = vcmask 31744   ;;  %vm118_vm2 = vcmask 261120  }
   0x4   :  { %v32_v5 = vpack.c.bf16 %v31_v1, %v31_v1  ;;  %181 = vset.pattern.permute.xlu2 %v208_v4  ;;  %v30_v9 = vld [vmem:[%s277_s2 + $0x18] sm:$0xff]  ;;  %v28_v10 = vld [vmem:[%s277_s2 + $0x8] sm:$0xff]  ;;  %v95_v11 = vld [vmem:[%s279_s4] sm:$0xff]  ;;  %s209_s9 = smov [#allocation2]   ;;  %s144_s13 = sshll.u32 %s280_s5, 4  ;;  %s145_s13 = int_to_ptr.hbm [resolvable:$true] %s144_s13 }
   0x5   :  { %105 = vperm.xlu2 %181, %v95_v11   ;;  %v96_v14 = vld [vmem:[%s279_s4 + $0x8] sm:$0xff]  ;;  %v173_v31 = vld [vmem:[%s278_s3] sm:$0xff]  ;;  %s142_s10 = sshll.u32 %s209_s9, 4  ;;  %s210_s3 = smov 128   ;;  %s143_s10 = int_to_ptr.vmem [resolvable:$true] %s142_s10 }
   0x6   :  { %v72_v6 = vsel %vm70_vm0, %v32_v5, 0  ;;  %s211_s14 = smov 8  }
   0x7   :  { %174 = vmatpush.bf16.msra.mxu2 %v72_v6  ;;  %81 = vmatpush.bf16.msra.mxu0 %v72_v6 }
   0xa   :  { %165 = vmatmul.msk.bf16.vlgmr.msra.gmra.mxu2 %vm63_vm1, %v172_v7  ;;  %164 = vmatmul.msk.bf16.vlgmr.msra.gmra.mxu0 %vm63_vm1, %v171_v8 }
   0xb   :  { %50 = vperm.xlu0 %179, %v30_v9   ;;  %40 = vperm.xlu1 %180, %v28_v10  }
   0xd   :  { %110 = vperm.xlu2 %181, %v96_v14  }
  0x5f   :  { %v106_v32 = vpop.permute.xlu2 %105 }
  0x67   :  { %v111_v35 = vpop.permute.xlu2 %110 }
  0x75   :  { %v36_v12 = vpop.permute.xlu1 %35  ;;  %v46_v15 = vpop.permute.xlu0 %45 }
  0x7d   :  { %v41_v17 = vpop.permute.xlu1 %40  ;;  %v51_v20 = vpop.permute.xlu0 %50 }
  0x87   :  { %v83_v13 = vpop.f32.mrf.mxu0 }
  0x88   :  { %v84_v22 = vadd.f32 %v83_v13, %v36_v12 }
  0x8a   :  { %v97_v27 = vmax.f32 %v84_v22, 0.0 }
  0x8d   :  { %v88_v16 = vpop.f32.mrf.mxu2 }
  0x8e   :  { %v89_v19 = vadd.f32 %v88_v16, %v46_v15 }
  0x8f   :  { %v85_v18 = vpop.f32.mrf.mxu0 }
  0x90   :  { %v86_v23 = vadd.f32 %v85_v18, %v41_v17  ;;  %v99_v25 = vmax.f32 %v89_v19, 0.0 }
  0x92   :  { %v98_v28 = vmax.f32 %v86_v23, 0.0 }
  0x94   :  { %v101_v30 = vpack.c.bf16 %v98_v28, %v97_v27 }
  0x95   :  { %v90_v21 = vpop.f32.mrf.mxu2 }
  0x96   :  { %v91_v24 = vadd.f32 %v90_v21, %v51_v20 }
  0x98   :  { %v100_v26 = vmax.f32 %v91_v24, 0.0 }
  0x9a   :  { %v102_v29 = vpack.c.bf16 %v100_v26, %v99_v25 }
  0x9c   :  { %128 = vmatpush.bf16.msra.mxu1 %v102_v29 }
  0xa0   :  { %129 = vmatpush.bf16.msra.mxu1 %v101_v30 }
  0xa3   :  { %170 = vmatmul.msk.bf16.vlgmr.msra.gmra.mxu1 %vm118_vm2, %v173_v31 }
 0x120   :  { %v131_v33 = vpop.f32.mrf.mxu1 }
 0x121   :  { %v132_v34 = vadd.f32 %v131_v33, %v106_v32 }
 0x123   :  { %136 = vst.msk [vmem:[#allocation2] sm:$0xff] %vm118_vm2, %v132_v34 }
 0x128   :  { %v133_v36 = vpop.f32.mrf.mxu1 }
 0x129   :  { %v134_v37 = vadd.f32 %v133_v36, %v111_v35 }
 0x12b   :  { %137 = vst.msk [vmem:[#allocation2 + $0x8] sm:$0xff] %vm118_vm2, %v134_v37 }
 0x12c   :  { %150 = dma.vmem_to_hbm [thread:$0]  %s143_s10, 256, %s145_s13, [#allocation3], %s210_s3, %s210_s3, %s211_s14  }
 0x12d   :  { %206 = dma.done.wait [#allocation3], 256  }
 0x12e   :  { %207 = vsyncadd [#allocation3], 4294967040 }
 0x12f   :  { %155 = vsyncpa [#allocation3], 1 }

</bundles_post_ra>
